<compile_context>
chip_gen: v5e
topology: v5e:2x2
jax: 0.10.0
libtpu: 0.0.40
codegen_flags: <defaults>
</compile_context>

<pallas_src>
import functools

import jax
import jax.numpy as jnp
from jax import lax
from jax.experimental import pallas as pl
from jax.experimental.pallas import tpu as pltpu

BETA = 60.0  # from ATLoss.__init__ (no learnable parameters)

_LANE = 128


def _round_up(x, m):
    return ((x + m - 1) // m) * m


def _sublane_multiple(dtype):
    # f32 -> 8, bf16/f16 -> 16, int8/fp8 -> 32 (sub-32-bit dtypes pack along sublanes).
    return {4: 8, 2: 16, 1: 32}.get(jnp.dtype(dtype).itemsize, 8)


def _vmem_capacity_bytes():
    try:
        return int(pltpu.get_tpu_info().vmem_capacity_bytes)
    except Exception:
        return 64 << 20  # conservative fallback = v7x physical VMEM


def _num_tensorcores():
    """Best-effort TensorCore-per-device count (megacore). Falls back to 1."""
    try:
        info = pltpu.get_tpu_info()
        for name in ("num_cores", "core_count", "tensorcore_count", "num_tensorcores"):
            v = getattr(info, name, None)
            if v:
                return max(1, min(int(v), 2))
    except Exception:
        pass
    try:
        v = getattr(jax.devices()[0], "num_cores", None)
        if v:
            return max(1, min(int(v), 2))
    except Exception:
        pass
    return 1


# ----------------------------- cross-entropy kernel -----------------------------
def _ce_kernel(logits_ref, tgt_ref, o_ref, m_acc, l_acc, p_acc, *, nc_true):
    j = pl.program_id(0)
    n_blk = pl.num_programs(0)
    tnc = logits_ref.shape[1]

    @pl.when(j == 0)
    def _init():
        m_acc[...] = jnp.full_like(m_acc, -jnp.inf)
        l_acc[...] = jnp.zeros_like(l_acc)
        p_acc[...] = jnp.zeros_like(p_acc)

    x = logits_ref[...].astype(jnp.float32)                       # (B, tnc)
    cols = j * tnc + lax.broadcasted_iota(jnp.int32, x.shape, 1)
    valid = cols < nc_true                                        # mask boundary-block padding
    xm = jnp.where(valid, x, -jnp.inf)

    # Online log-sum-exp over class chunks.
    m_prev = m_acc[...]
    m_new = jnp.maximum(m_prev, jnp.max(xm, axis=1, keepdims=True))
    l_acc[...] = (jnp.exp(m_prev - m_new) * l_acc[...]
                  + jnp.sum(jnp.exp(xm - m_new), axis=1, keepdims=True))
    m_acc[...] = m_new
    # Picked (target) logit.  TODO(synk): PyTorch's ignore_index=-100 rows are not excluded.
    p_acc[...] += jnp.sum(jnp.where(cols == tgt_ref[...], x, 0.0), axis=1, keepdims=True)

    @pl.when(j == n_blk - 1)
    def _finalize():
        lse = m_acc[...] + jnp.log(l_acc[...])
        ce = jnp.sum(lse - p_acc[...]) / jnp.float32(x.shape[0])  # mean over batch
        o_ref[...] = jnp.full((1, 1), ce, dtype=jnp.float32)


def cross_entropy(logits, targets, *, class_block_bytes=4 << 20):
    B, NC = logits.shape
    itemsize = jnp.dtype(logits.dtype).itemsize
    tgt = targets.astype(jnp.int32).reshape(B, 1)

    # Class-chunk tile: full NC when it fits, otherwise a 128-aligned chunk.
    tnc_cap = max(_LANE, (class_block_bytes // max(1, B * itemsize)) // _LANE * _LANE)
    tnc = NC if NC <= tnc_cap else tnc_cap
    n_blk = pl.cdiv(NC, tnc)

    cap = _vmem_capacity_bytes()
    vmem_limit = int(min(cap, 2 * B * _round_up(tnc, _LANE) * itemsize + (8 << 20)))

    out = pl.pallas_call(
        functools.partial(_ce_kernel, nc_true=NC),
        out_shape=jax.ShapeDtypeStruct((1, 1), jnp.float32),
        grid_spec=pltpu.PrefetchScalarGridSpec(
            num_scalar_prefetch=0,
            grid=(n_blk,),
            in_specs=[pl.BlockSpec((B, tnc), lambda j: (0, j)),
                      pl.BlockSpec((B, 1), lambda j: (0, 0))],
            out_specs=pl.BlockSpec((1, 1), lambda j: (0, 0)),
            scratch_shapes=[pltpu.VMEM((B, 1), jnp.float32),
                            pltpu.VMEM((B, 1), jnp.float32),
                            pltpu.VMEM((B, 1), jnp.float32)],
        ),
        compiler_params=pltpu.CompilerParams(
            dimension_semantics=("arbitrary",),
            vmem_limit_bytes=vmem_limit),
    )(logits, tgt)
    return out[0, 0]


# ------------------------- attention-transfer partials kernel -------------------------
def _at_kernel(ms_ref, mt_ref, out_ref, qs_acc, qt_acc, *, c_true, n_sub):
    c = pl.program_id(2)
    n_c = pl.num_programs(2)
    b_tile, tc, hw = ms_ref.shape

    @pl.when(c == 0)
    def _init():
        qs_acc[...] = jnp.zeros_like(qs_acc)
        qt_acc[...] = jnp.zeros_like(qt_acc)

    def _accumulate(valid_rows):
        xs = ms_ref[...].astype(jnp.float32)
        xt = mt_ref[...].astype(jnp.float32)
        if valid_rows is not None:
            # Boundary channel block: rows >= valid_rows are unspecified padding.
            ch = lax.broadcasted_iota(jnp.int32, xs.shape, 1)
            keep = ch < valid_rows
            xs = jnp.where(keep, xs, 0.0)
            xt = jnp.where(keep, xt, 0.0)
        if n_sub > 1:
            # Sublane-group partial sums: pure VPU adds per loaded vreg; the single
            # cross-sublane collapse happens once in the finalize step.
            xs = xs.reshape(b_tile, tc // n_sub, n_sub, hw)
            xt = xt.reshape(b_tile, tc // n_sub, n_sub, hw)
            qs_acc[...] += jnp.sum(xs, axis=1)
            qt_acc[...] += jnp.sum(xt, axis=1)
        else:
            qs_acc[...] += jnp.sum(xs, axis=1, keepdims=True)
            qt_acc[...] += jnp.sum(xt, axis=1, keepdims=True)

    tail = c_true % tc
    if tail:
        @pl.when(c < n_c - 1)
        def _full_blocks():
            _accumulate(None)

        @pl.when(c == n_c - 1)
        def _tail_block():
            _accumulate(tail)
    else:
        _accumulate(None)

    @pl.when(c == n_c - 1)
    def _finalize():
        qs = jnp.sum(qs_acc[...], axis=1)                             # (b_tile, HW)
        qt = jnp.sum(qt_acc[...], axis=1)
        out_ref[:, 0:1] = jnp.sum(qs * qs, axis=1, keepdims=True)     # ||qs_b||^2
        out_ref[:, 1:2] = jnp.sum(qt * qt, axis=1, keepdims=True)     # ||qt_b||^2
        out_ref[:, 2:3] = jnp.sum(qs * qt, axis=1, keepdims=True)     # <qs_b, qt_b>


def _at_group_partials(ms, mt):
    """ms, mt: (P, B, C, HW) same-shape pairs.  Returns (P, NB, b_tile, 3) f32
    partials [||qs_b||^2, ||qt_b||^2, <qs_b, qt_b>] per (pair, batch row)."""
    assert ms.shape == mt.shape
    P, B, C, HW = ms.shape
    itemsize = jnp.dtype(ms.dtype).itemsize
    sub = _sublane_multiple(ms.dtype)
    hw_lanes = _round_up(HW, _LANE)

    # Megacore: when the pair axis alone cannot feed both TensorCores, split the
    # batch into a second "parallel" axis.  No-op (nb == 1) on 1-TC chips.
    n_cores = _num_tensorcores()
    nb = n_cores if (n_cores > 1 and P < n_cores and B >= n_cores) else 1
    b_tile = pl.cdiv(B, nb)
    nb = pl.cdiv(B, b_tile)

    cap = _vmem_capacity_bytes()
    # Input-block budget: 2 arrays x 2 pipeline buffers, sized from the device VMEM
    # (64 MiB on v7x, 128 MiB on v5e/v6e) and capped — the HBM roofline saturates
    # around a few MiB per block; accumulators/output/compiler scratch keep headroom.
    acc_bytes = 2 * b_tile * 8 * hw_lanes * 4
    in_budget = int(min(max(cap * 2 // 5, 8 << 20), 32 << 20))
    per_c_bytes = 2 * 2 * b_tile * hw_lanes * itemsize
    if 2 * 2 * b_tile * _round_up(C, sub) * hw_lanes * itemsize <= in_budget:
        tc = C
    else:
        tc = max(sub, (in_budget // per_c_bytes) // sub * sub)
        tc = min(tc, C)
    n_sub = 8 if tc % 8 == 0 else 1
    n_c = pl.cdiv(C, tc)

    in_block_bytes = 2 * 2 * b_tile * _round_up(tc, sub) * hw_lanes * itemsize
    vmem_limit = int(min(cap, in_block_bytes + acc_bytes + (16 << 20)))

    return pl.pallas_call(
        functools.partial(_at_kernel, c_true=C, n_sub=n_sub),
        out_shape=jax.ShapeDtypeStruct((P, nb, b_tile, 3), jnp.float32),
        grid_spec=pltpu.PrefetchScalarGridSpec(
            num_scalar_prefetch=0,
            grid=(P, nb, n_c),
            in_specs=[pl.BlockSpec((None, b_tile, tc, HW), lambda p, b, c: (p, b, c, 0)),
                      pl.BlockSpec((None, b_tile, tc, HW), lambda p, b, c: (p, b, c, 0))],
            out_specs=pl.BlockSpec((None, None, b_tile, 3), lambda p, b, c: (p, b, 0, 0)),
            scratch_shapes=[pltpu.VMEM((b_tile, n_sub, HW), jnp.float32),
                            pltpu.VMEM((b_tile, n_sub, HW), jnp.float32)],
        ),
        compiler_params=pltpu.CompilerParams(
            dimension_semantics=("parallel", "parallel", "arbitrary"),
            vmem_limit_bytes=vmem_limit),
    )(ms, mt)


def _stack_flat(arrs):
    B, C, H, W = arrs[0].shape
    flat = [a.reshape(1, B, C, H * W) for a in arrs]   # free reshape
    return flat[0] if len(flat) == 1 else jnp.concatenate(flat, axis=0)


# ------------------------------------ ATLoss -------------------------------------
def at_loss(output, target, mat_s, mat_t, beta=BETA, *, stack_bytes_limit=4 << 20):
    ce = cross_entropy(output, target)

    # Group same-shape student/teacher pairs so they share a single pallas_call
    # (leading "pair" grid axis).  Large same-shape pairs are launched separately to
    # avoid materializing a stacked HBM copy.
    groups = {}
    for s, t in zip(mat_s, mat_t):
        assert s.shape == t.shape, (s.shape, t.shape)
        groups.setdefault(s.shape, ([], []))
        groups[s.shape][0].append(s)
        groups[s.shape][1].append(t)

    at = jnp.float32(0.0)
    for shape, (ss, ts) in groups.items():
        B, C, H, W = shape
        HW = H * W
        pair_bytes = B * C * HW * jnp.dtype(ss[0].dtype).itemsize
        if len(ss) > 1 and pair_bytes > stack_bytes_limit:
            chunks = [([s], [t]) for s, t in zip(ss, ts)]
        else:
            chunks = [(ss, ts)]
        for css, cts in chunks:
            parts = _at_group_partials(_stack_flat(css), _stack_flat(cts))
            P = parts.shape[0]
            parts = parts.reshape(P, -1, 3)[:, :B, :]   # drop padded batch rows
            ns2 = parts[..., 0]                          # (P, B)
            nt2 = parts[..., 1]
            st = parts[..., 2]
            # Stable per-(b, i) combine of the PyTorch (B,H,W)/(B,1,1,1) broadcast MSE:
            #   sum_{i,b} ||qs_b/ns_i - qt_b/nt_i||^2
            #     = sum_{i,b} ns2_b/ns2_i + nt2_b/nt2_i - 2 st_b/(ns_i nt_i)
            # TODO(synk): like the PyTorch module, no eps — an all-zero channel-sum
            # map yields inf/NaN.
            ratio = (ns2[:, :, None] / ns2[:, None, :]
                     + nt2[:, :, None] / nt2[:, None, :]
                     - 2.0 * st[:, :, None] / jnp.sqrt(ns2[:, None, :] * nt2[:, None, :]))
            at = at + jnp.sum(ratio) / jnp.float32(B * B * HW)
    return ce + beta / 2.0 * at


# ----------------------------- pure-JAX reference --------------------------------
def _normalize_ref(m):
    B = m.shape[0]
    norm = jnp.sqrt(jnp.sum(m.reshape(B, -1) ** 2, axis=1)).reshape(B, 1, 1, 1)
    return m / norm   # (B,H,W)/(B,1,1,1) -> (B,B,H,W), as in the PyTorch module


def at_loss_ref(output, target, mat_s, mat_t, beta=BETA):
    logp = jax.nn.log_softmax(output, axis=1)
    ce = -jnp.mean(jnp.take_along_axis(logp, target[:, None], axis=1))
    at = 0.0
    for s, t in zip(mat_s, mat_t):
        qs = jnp.sum(s, axis=1)
        qt = jnp.sum(t, axis=1)
        at = at + jnp.mean((_normalize_ref(qs) - _normalize_ref(qt)) ** 2)
    return ce + beta / 2.0 * at


if __name__ == "__main__":
    key = jax.random.PRNGKey(0)
    ks = jax.random.split(key, 8)

    B, NC = 2, 10
    output = jax.random.normal(ks[0], (B, NC), dtype=jnp.float32)
    target = jax.random.randint(ks[1], (B,), 0, NC, dtype=jnp.int32)
    # Three student/teacher feature-map pairs (PyTorch NCHW layout); the first and
    # third share a shape and therefore share one fused pallas_call.
    shapes = [(B, 4, 16, 16), (B, 8, 8, 8), (B, 4, 16, 16)]
    mat_s = [jax.random.normal(ks[2 + i], s, dtype=jnp.float32) for i, s in enumerate(shapes)]
    mat_t = [jax.random.normal(ks[5 + i], s, dtype=jnp.float32) for i, s in enumerate(shapes)]

    loss = at_loss(output, target, mat_s, mat_t)
    loss = jax.block_until_ready(loss)

    ref = at_loss_ref(output, target, mat_s, mat_t)
    assert jnp.allclose(loss, ref, rtol=1e-4, atol=1e-5), (loss, ref)
    print("KERNEL_OK")
</pallas_src>

<mosaic_0001>
module attributes {stable_mosaic.version = 11 : i64} {
  func.func @_ce_kernel(%arg0: i32, %arg1: memref<2x10xf32, #tpu.memory_space<vmem>>, %arg2: memref<2x1xi32, #tpu.memory_space<vmem>>, %arg3: memref<1x1xf32, #tpu.memory_space<vmem>>, %arg4: memref<2x1xf32, #tpu.memory_space<vmem>>, %arg5: memref<2x1xf32, #tpu.memory_space<vmem>>, %arg6: memref<2x1xf32, #tpu.memory_space<vmem>>) attributes {dimension_semantics = [#tpu.dimension_semantics<arbitrary>], iteration_bounds = array<i64: 1>, scalar_prefetch = 0 : i64, scratch_operands = 3 : i64, tpu.core_type = #tpu.core_type<tc>, window_params = [{transform_indices = @transform_0, window_bounds = array<i64: 2, 10>}, {pipeline_mode = #tpu.pipeline_mode<synchronous>, transform_indices = @transform_1, window_bounds = array<i64: 2, 1>}, {pipeline_mode = #tpu.pipeline_mode<synchronous>, transform_indices = @transform_2, window_bounds = array<i64: 1, 1>}]} {
    %c0_i32 = arith.constant 0 : i32
    %0 = arith.cmpi eq, %arg0, %c0_i32 : i32
    %1 = arith.extui %0 : i1 to i32
    %c0_i32_0 = arith.constant 0 : i32
    %2 = arith.cmpi ne, %1, %c0_i32_0 : i32
    scf.if %2 {
      %cst_23 = arith.constant 0xFF800000 : f32
      %41 = vector.broadcast %cst_23 : f32 to vector<2x1xf32>
      %c0_24 = arith.constant 0 : index
      %c0_25 = arith.constant 0 : index
      %42 = vector.load %arg4[%c0_24, %c0_25] : memref<2x1xf32, #tpu.memory_space<vmem>>, vector<2x1xf32>
      tpu.vector_store %arg4[%c0_24, %c0_25], %41 {strides = array<i32>} : memref<2x1xf32, #tpu.memory_space<vmem>>, vector<2x1xf32>,
      %cst_26 = arith.constant 0.000000e+00 : f32
      %43 = vector.broadcast %cst_26 : f32 to vector<2x1xf32>
      %c0_27 = arith.constant 0 : index
      %c0_28 = arith.constant 0 : index
      %44 = vector.load %arg5[%c0_27, %c0_28] : memref<2x1xf32, #tpu.memory_space<vmem>>, vector<2x1xf32>
      tpu.vector_store %arg5[%c0_27, %c0_28], %43 {strides = array<i32>} : memref<2x1xf32, #tpu.memory_space<vmem>>, vector<2x1xf32>,
      %cst_29 = arith.constant 0.000000e+00 : f32
      %45 = vector.broadcast %cst_29 : f32 to vector<2x1xf32>
      %c0_30 = arith.constant 0 : index
      %c0_31 = arith.constant 0 : index
      %46 = vector.load %arg6[%c0_30, %c0_31] : memref<2x1xf32, #tpu.memory_space<vmem>>, vector<2x1xf32>
      tpu.vector_store %arg6[%c0_30, %c0_31], %45 {strides = array<i32>} : memref<2x1xf32, #tpu.memory_space<vmem>>, vector<2x1xf32>,
    } else {
    }
    %c0 = arith.constant 0 : index
    %c0_1 = arith.constant 0 : index
    %3 = vector.load %arg1[%c0, %c0_1] : memref<2x10xf32, #tpu.memory_space<vmem>>, vector<2x10xf32>
    %c10_i32 = arith.constant 10 : i32
    %4 = arith.muli %arg0, %c10_i32 : i32
    %5 = tpu.iota {dimensions = array<i32: 1>} : vector<2x10xi32>
    %6 = vector.broadcast %4 : i32 to vector<2x10xi32>
    %7 = arith.addi %6, %5 : vector<2x10xi32>
    %c10_i32_2 = arith.constant 10 : i32
    %8 = vector.broadcast %c10_i32_2 : i32 to vector<2x10xi32>
    %9 = arith.cmpi slt, %7, %8 : vector<2x10xi32>
    %cst = arith.constant 0xFF800000 : f32
    %10 = vector.broadcast %cst : f32 to vector<2x10xf32>
    %11 = arith.select %9, %3, %10 : vector<2x10xi1>, vector<2x10xf32>
    %c0_3 = arith.constant 0 : index
    %c0_4 = arith.constant 0 : index
    %12 = vector.load %arg4[%c0_3, %c0_4] : memref<2x1xf32, #tpu.memory_space<vmem>>, vector<2x1xf32>
    %cst_5 = arith.constant dense<0xFF800000> : vector<2xf32>
    %13 = vector.multi_reduction <maximumf>, %11, %cst_5 [1] : vector<2x10xf32> to vector<2xf32>
    %14 = vector.shape_cast %13 : vector<2xf32> to vector<2x1xf32>
    %15 = arith.maximumf %12, %14 : vector<2x1xf32>
    %16 = arith.subf %12, %15 : vector<2x1xf32>
    %17 = math.exp %16 : vector<2x1xf32>
    %c0_6 = arith.constant 0 : index
    %c0_7 = arith.constant 0 : index
    %18 = vector.load %arg5[%c0_6, %c0_7] : memref<2x1xf32, #tpu.memory_space<vmem>>, vector<2x1xf32>
    %19 = arith.mulf %17, %18 : vector<2x1xf32>
    %20 = vector.broadcast %15 : vector<2x1xf32> to vector<2x10xf32>
    %21 = arith.subf %11, %20 : vector<2x10xf32>
    %22 = math.exp %21 : vector<2x10xf32>
    %cst_8 = arith.constant dense<0.000000e+00> : vector<2xf32>
    %23 = vector.multi_reduction <add>, %22, %cst_8 [1] : vector<2x10xf32> to vector<2xf32>
    %24 = vector.shape_cast %23 : vector<2xf32> to vector<2x1xf32>
    %25 = arith.addf %19, %24 : vector<2x1xf32>
    %c0_9 = arith.constant 0 : index
    %c0_10 = arith.constant 0 : index
    %26 = vector.load %arg5[%c0_9, %c0_10] : memref<2x1xf32, #tpu.memory_space<vmem>>, vector<2x1xf32>
    tpu.vector_store %arg5[%c0_9, %c0_10], %25 {strides = array<i32>} : memref<2x1xf32, #tpu.memory_space<vmem>>, vector<2x1xf32>,
    %c0_11 = arith.constant 0 : index
    %c0_12 = arith.constant 0 : index
    %27 = vector.load %arg4[%c0_11, %c0_12] : memref<2x1xf32, #tpu.memory_space<vmem>>, vector<2x1xf32>
    tpu.vector_store %arg4[%c0_11, %c0_12], %15 {strides = array<i32>} : memref<2x1xf32, #tpu.memory_space<vmem>>, vector<2x1xf32>,
    %c0_13 = arith.constant 0 : index
    %c0_14 = arith.constant 0 : index
    %28 = vector.load %arg6[%c0_13, %c0_14] : memref<2x1xf32, #tpu.memory_space<vmem>>, vector<2x1xf32>
    %c0_15 = arith.constant 0 : index
    %c0_16 = arith.constant 0 : index
    %29 = vector.load %arg2[%c0_15, %c0_16] : memref<2x1xi32, #tpu.memory_space<vmem>>, vector<2x1xi32>
    %30 = vector.broadcast %29 : vector<2x1xi32> to vector<2x10xi32>
    %31 = arith.cmpi eq, %7, %30 : vector<2x10xi32>
    %cst_17 = arith.constant 0.000000e+00 : f32
    %32 = vector.broadcast %cst_17 : f32 to vector<2x10xf32>
    %33 = arith.select %31, %3, %32 : vector<2x10xi1>, vector<2x10xf32>
    %cst_18 = arith.constant dense<0.000000e+00> : vector<2xf32>
    %34 = vector.multi_reduction <add>, %33, %cst_18 [1] : vector<2x10xf32> to vector<2xf32>
    %35 = vector.shape_cast %34 : vector<2xf32> to vector<2x1xf32>
    %36 = arith.addf %28, %35 : vector<2x1xf32>
    %c0_19 = arith.constant 0 : index
    %c0_20 = arith.constant 0 : index
    %37 = vector.load %arg6[%c0_19, %c0_20] : memref<2x1xf32, #tpu.memory_space<vmem>>, vector<2x1xf32>
    tpu.vector_store %arg6[%c0_19, %c0_20], %36 {strides = array<i32>} : memref<2x1xf32, #tpu.memory_space<vmem>>, vector<2x1xf32>,
    %c0_i32_21 = arith.constant 0 : i32
    %38 = arith.cmpi eq, %arg0, %c0_i32_21 : i32
    %39 = arith.extui %38 : i1 to i32
    %c0_i32_22 = arith.constant 0 : i32
    %40 = arith.cmpi ne, %39, %c0_i32_22 : i32
    scf.if %40 {
      %c0_23 = arith.constant 0 : index
      %c0_24 = arith.constant 0 : index
      %41 = vector.load %arg4[%c0_23, %c0_24] : memref<2x1xf32, #tpu.memory_space<vmem>>, vector<2x1xf32>
      %c0_25 = arith.constant 0 : index
      %c0_26 = arith.constant 0 : index
      %42 = vector.load %arg5[%c0_25, %c0_26] : memref<2x1xf32, #tpu.memory_space<vmem>>, vector<2x1xf32>
      %43 = math.log %42 : vector<2x1xf32>
      %44 = arith.addf %41, %43 : vector<2x1xf32>
      %c0_27 = arith.constant 0 : index
      %c0_28 = arith.constant 0 : index
      %45 = vector.load %arg6[%c0_27, %c0_28] : memref<2x1xf32, #tpu.memory_space<vmem>>, vector<2x1xf32>
      %46 = arith.subf %44, %45 : vector<2x1xf32>
      %47 = vector.shape_cast %46 : vector<2x1xf32> to vector<1x2x1xf32>
      %cst_29 = arith.constant dense<0.000000e+00> : vector<1xf32>
      %48 = vector.multi_reduction <add>, %47, %cst_29 [1, 2] : vector<1x2x1xf32> to vector<1xf32>
      %49 = vector.shape_cast %48 : vector<1xf32> to vector<1x1x1xf32>
      %50 = vector.extract %49[0, 0, 0] : f32 from vector<1x1x1xf32>
      %cst_30 = arith.constant 2.000000e+00 : f32
      %51 = arith.divf %50, %cst_30 : f32
      %52 = vector.broadcast %51 : f32 to vector<1x1xf32>
      %c0_31 = arith.constant 0 : index
      %c0_32 = arith.constant 0 : index
      %53 = vector.load %arg3[%c0_31, %c0_32] : memref<1x1xf32, #tpu.memory_space<vmem>>, vector<1x1xf32>
      tpu.vector_store %arg3[%c0_31, %c0_32], %52 {strides = array<i32>} : memref<1x1xf32, #tpu.memory_space<vmem>>, vector<1x1xf32>,
    } else {
    }
    return
  }
  func.func @transform_0(%arg0: i32) -> (i32, i32) {
    %c0_i32 = arith.constant 0 : i32
    %c0_i32_0 = arith.constant 0 : i32
    return %c0_i32, %arg0 : i32, i32
  }
  func.func @transform_1(%arg0: i32) -> (i32, i32) {
    %c0_i32 = arith.constant 0 : i32
    %c0_i32_0 = arith.constant 0 : i32
    %c0_i32_1 = arith.constant 0 : i32
    return %c0_i32, %c0_i32_0 : i32, i32
  }
  func.func @transform_2(%arg0: i32) -> (i32, i32) {
    %c0_i32 = arith.constant 0 : i32
    %c0_i32_0 = arith.constant 0 : i32
    %c0_i32_1 = arith.constant 0 : i32
    return %c0_i32, %c0_i32_0 : i32, i32
  }
}

</mosaic_0001>

<bundles_post_ra>
// kernel: tpu_custom_call.1
= control target key start
LH: loop header
LB: loop body
LE: loop exit
PB: predicated region body
PF: predicated region fallthrough
CT: control target
= control target key end

     0   :  { %v22_v0 = vlaneseq  ;;  %s198_s0 = inlined_call_operand.vmem [shape: f32[2,10], index: 0, kind: input, shape index: {}]   ;;  %s199_s1 = inlined_call_operand.vmem [shape: s32[2,1], index: 1, kind: input, shape index: {}]   ;;  %s200_s2 = inlined_call_operand.hbm [shape: f32[1,1], index: 2, kind: output, shape index: {}]  }
   0x1   :  { %7 = vsyncpa [#allocation6], 0  ;;  %v20_v1 = vld [vmem:[%s198_s0] sm:$0x3]  ;;  %vm29_vm0 = vcmask 74752   ;;  %vm16_vm2 = vcmask 1024  }
   0x2   :  { %v23_v2 = vand.u32 127, %v22_v0  ;;  %v159_v5 = vmov -inf   ;;  %v160_v6 = vmov 0   ;;  %v161_v7 = vmov 0.0   ;;  %v55_v8 = vld [vmem:[%s199_s1] sm:$0x3] }
   0x3   :  { %17 = vst.msk [vmem:[#allocation2] sm:$0x3] %vm16_vm2, %v159_v5  ;;  %123 = vset.pattern.permute.xlu0 %v160_v6  ;;  %124 = vset.pattern.permute.xlu1 %v160_v6  ;;  %v162_v38 = vmov 2.0   ;;  %s163_s0 = smov [#allocation5]   ;;  %s105_s16 = sshll.u32 %s200_s2, 4  ;;  %vm96_vm5 = vcmask 0   ;;  %s106_s16 = int_to_ptr.hbm [resolvable:$true] %s105_s16 }
   0x4   :  { %vm26_vm1 = vcmp.lt.s32.totalorder %v23_v2, 10  ;;  %18 = vst.msk [vmem:[#allocation3] sm:$0x3] %vm16_vm2, %v161_v7  ;;  %57 = vperm.xlu1 %124, %v55_v8   ;;  %s103_s1 = sshll.u32 %s163_s0, 4  ;;  %s104_s1 = int_to_ptr.vmem [resolvable:$true] %s103_s1 }
   0x5   :  { %v27_v3 = vsel %vm26_vm1, %v20_v1, -inf  ;;  %19 = vst.msk [vmem:[#allocation4] sm:$0x3] %vm16_vm2, %v161_v7 }
   0x6   :  { %v30_v4 = vsel %vm29_vm0, %v27_v3, -inf }
   0x7   :  { %31 = vmax.xlane.f32.xlu0 %v30_v4 }
   0xa   :  { %v28_v9 = vld [vmem:[#allocation2] sm:$0x3] }
   0xb   :  { %v37_v26 = vld [vmem:[#allocation3] sm:$0x3] }
   0xc   :  { %v54_v21 = vld [vmem:[#allocation4] sm:$0x3] }
  0x76   :  { %v58_v13 = vpop.permute.xlu1 %57 }
  0x77   :  { %vm59_vm3 = vcmp.eq.s32.totalorder %v23_v2, %v58_v13 }
  0x78   :  { %v60_v14 = vsel %vm59_vm3, %v20_v1, 0.0 }
  0x79   :  { %v61_v15 = vsel %vm29_vm0, %v60_v14, 0.0 }
  0x7a   :  { %v32_v10 = vpop.xlane.xlu0 %31  ;;  %62 = vadd.xlane.f32.xlu2 %v61_v15 }
  0x7b   :  { %v33_v11 = vmax.f32 %v28_v9, %v32_v10 }
  0x7d   :  { %v34_v12 = vsub.f32 %v28_v9, %v33_v11  ;;  %53 = vst.msk [vmem:[#allocation2] sm:$0x3] %vm16_vm2, %v33_v11  ;;  %41 = vperm.xlu0 %123, %v33_v11  }
  0x7f   :  { %v35_v24 = vmul.f32 1.442695, %v34_v12 }
  0x84   :  { %v69_v33 = vld [vmem:[#allocation2] sm:$0x3] }
  0xed   :  { %v63_v22 = vpop.xlane.xlu2 %62 }
  0xee   :  { %v64_v23 = vadd.f32 %v63_v22, %v54_v21 }
  0xef   :  { %v42_v16 = vpop.permute.xlu0 %41 }
  0xf0   :  { %v44_v17 = vsub.f32 %v27_v3, %v42_v16  ;;  %65 = vst.msk [vmem:[#allocation4] sm:$0x3] %vm16_vm2, %v64_v23 }
  0xf2   :  { %v45_v18 = vmul.f32 1.442695, %v44_v17 }
  0xf4   :  { %125 = vpow2.f32 %v45_v18 }
  0xf5   :  { %127 = vpow2.f32 %v35_v24 }
  0xf7   :  { %v74_v34 = vld [vmem:[#allocation4] sm:$0x3] }
  0xfa   :  { %v126_v19 = vpop.eup %125 }
  0xfb   :  { %v47_v20 = vsel %vm29_vm0, %v126_v19, 0.0  ;;  %v128_v25 = vpop.eup %127 }
  0xfc   :  { %48 = vadd.xlane.f32.xlu1 %v47_v20  ;;  %v38_v27 = vmul.f32 %v128_v25, %v37_v26 }
 0x16f   :  { %v49_v28 = vpop.xlane.xlu1 %48 }
 0x170   :  { %v50_v29 = vadd.f32 %v49_v28, %v38_v27 }
 0x172   :  { %52 = vst.msk [vmem:[#allocation3] sm:$0x3] %vm16_vm2, %v50_v29 }
 0x179   :  { %v70_v30 = vld [vmem:[#allocation3] sm:$0x3] }
 0x17a   :  { %129 = vlog2.f32 %v70_v30 }
 0x17b   :  { %131 = vrcp.f32 %v162_v38 }
 0x180   :  { %v130_v31 = vpop.eup %129 }
 0x181   :  { %v72_v32 = vmul.f32 0.6931472, %v130_v31  ;;  %v132_v39 = vpop.eup %131 }
 0x182   :  { %v87_v40 = vmul.f32 2.0, %v132_v39  ;;  %vm91_vm4 = vweird.f32 %v132_v39 }
 0x183   :  { %v73_v35 = vadd.f32 %v72_v32, %v69_v33 }
 0x184   :  { %v88_v41 = vsub.f32 1.0, %v87_v40 }
 0x185   :  { %v75_v36 = vsub.f32 %v73_v35, %v74_v34 }
 0x186   :  { %v89_v45 = vmul.f32 %v132_v39, %v88_v41 }
 0x187   :  { %v76_v37 = vsel %vm16_vm2, %v75_v36, 0.0 }
 0x188   :  { %77 = vadd.xlane.f32.xlu2 %v76_v37  ;;  %v90_v48 = vadd.f32 %v132_v39, %v89_v45 }
 0x18a   :  { %v92_v51 = vsel %vm91_vm4, %v132_v39, %v90_v48 }
 0x1fb   :  { %v78_v42 = vpop.xlane.xlu2 %77 }
 0x1fc   :  { %v79_v43 = vrot.slane %v78_v42, 4 }
 0x1fe   :  { %v80_v44 = vadd.f32 %v79_v43, %v78_v42 }
 0x200   :  { %v81_v46 = vrot.slane %v80_v44, 2 }
 0x202   :  { %v82_v47 = vadd.f32 %v81_v46, %v80_v44 }
 0x204   :  { %v83_v49 = vrot.slane %v82_v47, 1 }
 0x206   :  { %v84_v50 = vadd.f32 %v83_v49, %v82_v47 }
 0x208   :  { %114 = vpush %v84_v50 }
 0x209   :  { %116 = vpush %v92_v51 }
 0x239   :  { %s115_s13 = spop %114 }
 0x23a   :  { %s117_s17 = spop %116 }
 0x23b   :  { %s94_s18 = smul.f32 %s117_s17, %s115_s13 }
 0x23d   :  { %v95_v52 = vstv %s94_s18 }
 0x23e   :  { %97 = vst.msk [vmem:[#allocation5] sm:$0x1] %vm96_vm5, %v95_v52 }
 0x23f   :  { %108 = dma.vmem_to_hbm [thread:$0]  %s104_s1, 16, %s106_s16, [#allocation6]  }
 0x240   :  { %157 = dma.done.wait [#allocation6], 16  }
 0x241   :  { %158 = vsyncadd [#allocation6], 4294967280 }
 0x242   :  { %113 = vsyncpa [#allocation6], 1 }

</bundles_post_ra>
